<compile_context>
chip_gen: v5e
topology: v5e:2x2
jax: 0.10.0
libtpu: 0.0.40
codegen_flags: <defaults>
</compile_context>

<pallas_src>
import functools

import jax
import jax.numpy as jnp
from jax.experimental import pallas as pl
from jax.experimental.pallas import tpu as pltpu

FP8_DTYPE = jnp.float8_e4m3fn
FP8_MAX = 448.0            # finfo(float8_e4m3fn).max
EPS = 1e-5


# ----------------------------- kernel helpers (traced inside the kernel) ----

def _rmsnorm(v, g, eps):
    # v: (t, H) f32, g: (1, H) f32
    ms = jnp.mean(v * v, axis=-1, keepdims=True)
    return v * jax.lax.rsqrt(ms + eps) * g


def _fp8_linear_per_token(v, w_bf16, ws_over_fp8max):
    # Dynamic per-token fp8 quantization (use_per_token_if_dynamic=True, scale=None):
    #   s   = max(|v|, axis=-1) / 448
    #   q   = fp8_round(clamp(v / s, -448, 448))
    #   out = (q @ w_fp8) * s * wscale
    # Rewritten as: inv_s via EUP reciprocal, matmul in bf16 (exact for fp8 values),
    # post-scale folded into a single multiply by amax * (wscale / 448).
    amax = jnp.max(jnp.abs(v), axis=-1, keepdims=True)
    amax = jnp.maximum(amax, 1e-12)                       # guard all-zero rows
    inv_s = FP8_MAX * pl.reciprocal(amax, approx=True)    # EUP slot, ~free
    q = jnp.clip(v * inv_s, -FP8_MAX, FP8_MAX)
    q = q.astype(FP8_DTYPE).astype(jnp.bfloat16)          # fp8 e4m3 rounding; exact in bf16
    # TODO(synk): on v7x, feed q and the weights as float8_e4m3fn directly to the
    #             MXU (native bf16+fp8 path) instead of upcasting to bf16.
    out = jnp.dot(q, w_bf16, preferred_element_type=jnp.float32)
    return out * (amax * ws_over_fp8max)                  # = out * s * wscale


def fused_testmodel_kernel(ws_ref,           # SMEM (2,) : [wscale0/448, wscale1/448]
                           x_ref,            # (tile_t, H)
                           g_ref,            # (3, H)  stacked RMSNorm weights
                           w0_ref, w1_ref,   # (H, H)  bf16 (fp8-valued) weights
                           o_ref,            # (tile_t, H)
                           *, eps):
    x = x_ref[...].astype(jnp.float32)
    g = g_ref[...]
    resid = jnp.sqrt(x)

    y = _rmsnorm(x, g[0:1, :], eps)
    x2 = _fp8_linear_per_token(y, w0_ref[...], ws_ref[0])

    resid = x2 + resid                                    # fused add
    y2 = _rmsnorm(resid, g[1:2, :], eps)
    x3 = _fp8_linear_per_token(y2, w1_ref[...], ws_ref[1])

    resid = x3 + resid
    y3 = _rmsnorm(resid, g[2:3, :], eps)

    o_ref[...] = y3.astype(o_ref.dtype)


# ----------------------------- wrapper --------------------------------------

def _pick_tile_t(T, max_tile=256):
    """Biggest multiple-of-8 tile (<= max_tile) dividing T, preferring >=2 grid
    steps so both v7x TensorCores get work."""
    best = None
    for cand in (256, 128, 64, 32, 16, 8):
        if cand > max_tile or T % cand:
            continue
        if best is None:
            best = cand
        if T // cand >= 2:
            return cand
    return best if best is not None else T


def test_model_forward(x, g0, g1, g2, w0_fp8, w1_fp8, wscale0, wscale1,
                       *, eps=EPS, tile_t=None):
    T, H = x.shape
    if tile_t is None:
        tile_t = _pick_tile_t(T)
    assert T % tile_t == 0

    # Weights: fp8 values carried in bf16 (exact) -> full-rate MXU, half the
    # VMEM/DMA of f32. Per-output-channel scale folded with 1/448 on the host.
    # TODO(synk): for H >= 2048 the two resident (H,H) weights no longer fit
    #             VMEM; add an output-column (N) grid axis marked "arbitrary".
    w0 = w0_fp8.astype(jnp.bfloat16)
    w1 = w1_fp8.astype(jnp.bfloat16)
    ws = (jnp.concatenate([wscale0.reshape(1), wscale1.reshape(1)])
          .astype(jnp.float32) / FP8_MAX)

    g = jnp.stack([g0, g1, g2]).astype(jnp.float32)       # (3, H) single slab

    kernel = functools.partial(fused_testmodel_kernel, eps=eps)

    return pl.pallas_call(
        kernel,
        out_shape=jax.ShapeDtypeStruct((T, H), x.dtype),
        grid=(T // tile_t,),
        in_specs=[
            pl.BlockSpec(memory_space=pltpu.SMEM),        # wscales (scalars)
            pl.BlockSpec((tile_t, H), lambda i: (i, 0)),  # x      : tiled over tokens
            pl.BlockSpec((3, H), lambda i: (0, 0)),       # stacked gammas
            pl.BlockSpec((H, H), lambda i: (0, 0)),       # w0 (resident every step)
            pl.BlockSpec((H, H), lambda i: (0, 0)),       # w1
        ],
        out_specs=pl.BlockSpec((tile_t, H), lambda i: (i, 0)),
        compiler_params=pltpu.CompilerParams(
            dimension_semantics=("parallel",),
            vmem_limit_bytes=32 * 1024 * 1024,
        ),
    )(ws, x, g, w0, w1)


# ----------------------------- pure-JAX reference ----------------------------

def _ref_forward(x, g0, g1, g2, w0_fp8, w1_fp8, wscale0, wscale1, eps=EPS):
    x = x.astype(jnp.float32)
    w0 = w0_fp8.astype(jnp.float32)
    w1 = w1_fp8.astype(jnp.float32)

    def rms(v, g):
        return v * jax.lax.rsqrt(jnp.mean(v * v, -1, keepdims=True) + eps) * g

    def lin(v, w, ws):
        s = jnp.max(jnp.abs(v), -1, keepdims=True) / FP8_MAX
        q = jnp.clip(v / s, -FP8_MAX, FP8_MAX).astype(FP8_DTYPE).astype(jnp.float32)
        return (q @ w) * s * ws

    resid = jnp.sqrt(x)
    y = rms(x, g0)
    x2 = lin(y, w0, wscale0)
    resid = x2 + resid
    y2 = rms(resid, g1)
    x3 = lin(y2, w1, wscale1)
    resid = x3 + resid
    return rms(resid, g2)


# ----------------------------- main ------------------------------------------

if __name__ == "__main__":
    T, H = 16, 128

    key = jax.random.PRNGKey(0)
    kx, kw0, kw1, ks0, ks1 = jax.random.split(key, 5)

    # x >= 0 so torch.sqrt(x)-style residual stays real.
    x = jax.random.uniform(kx, (T, H), dtype=jnp.float32)

    # RMSNorm weights initialize to ones (as in vLLM's RMSNorm).
    g0 = jnp.ones((H,), jnp.float32)
    g1 = jnp.ones((H,), jnp.float32)
    g2 = jnp.ones((H,), jnp.float32)

    # w = rand(H, H).to(fp8).t()  -> fp8 weight of shape (H_in, H_out)
    w0_fp8 = jax.random.uniform(kw0, (H, H), dtype=jnp.float32).astype(FP8_DTYPE).T
    w1_fp8 = jax.random.uniform(kw1, (H, H), dtype=jnp.float32).astype(FP8_DTYPE).T

    wscale0 = jax.random.uniform(ks0, (1,), dtype=jnp.float32)
    wscale1 = jax.random.uniform(ks1, (1,), dtype=jnp.float32)

    out = test_model_forward(x, g0, g1, g2, w0_fp8, w1_fp8, wscale0, wscale1)
    out = jax.block_until_ready(out)

    ref = _ref_forward(x, g0, g1, g2, w0_fp8, w1_fp8, wscale0, wscale1)

    assert out.shape == (T, H) and out.dtype == jnp.float32
    assert bool(jnp.all(jnp.isfinite(out)))
    assert bool(jnp.allclose(out, ref, rtol=2e-2, atol=2e-2)), "mismatch vs reference"

    print("KERNEL_OK")
</pallas_src>

<mosaic_0001>
module attributes {stable_mosaic.version = 11 : i64} {
  func.func @fused_testmodel_kernel(%arg0: i32, %arg1: memref<2xf32, #tpu.memory_space<smem>>, %arg2: memref<8x128xf32, #tpu.memory_space<vmem>>, %arg3: memref<3x128xf32, #tpu.memory_space<vmem>>, %arg4: memref<128x128xbf16, #tpu.memory_space<vmem>>, %arg5: memref<128x128xbf16, #tpu.memory_space<vmem>>, %arg6: memref<8x128xf32, #tpu.memory_space<vmem>>) attributes {dimension_semantics = [#tpu.dimension_semantics<parallel>], iteration_bounds = array<i64: 2>, scalar_prefetch = 0 : i64, scratch_operands = 0 : i64, tpu.core_type = #tpu.core_type<tc>, window_params = [{transform_indices = @transform_0, window_bounds = array<i64: 2>}, {transform_indices = @transform_1, window_bounds = array<i64: 8, 128>}, {pipeline_mode = #tpu.pipeline_mode<synchronous>, transform_indices = @transform_2, window_bounds = array<i64: 3, 128>}, {pipeline_mode = #tpu.pipeline_mode<synchronous>, transform_indices = @transform_3, window_bounds = array<i64: 128, 128>}, {pipeline_mode = #tpu.pipeline_mode<synchronous>, transform_indices = @transform_4, window_bounds = array<i64: 128, 128>}, {transform_indices = @transform_5, window_bounds = array<i64: 8, 128>}]} {
    %c0 = arith.constant 0 : index
    %c0_0 = arith.constant 0 : index
    %0 = vector.load %arg2[%c0, %c0_0] : memref<8x128xf32, #tpu.memory_space<vmem>>, vector<8x128xf32>
    %c0_1 = arith.constant 0 : index
    %c0_2 = arith.constant 0 : index
    %1 = vector.load %arg3[%c0_1, %c0_2] : memref<3x128xf32, #tpu.memory_space<vmem>>, vector<3x128xf32>
    %2 = math.sqrt %0 : vector<8x128xf32>
    %3 = vector.extract_strided_slice %1 {offsets = [0, 0], sizes = [1, 128], strides = [1, 1]} : vector<3x128xf32> to vector<1x128xf32>
    %4 = arith.mulf %0, %0 : vector<8x128xf32>
    %cst = arith.constant dense<0.000000e+00> : vector<8xf32>
    %5 = vector.multi_reduction <add>, %4, %cst [1] : vector<8x128xf32> to vector<8xf32>
    %6 = vector.shape_cast %5 : vector<8xf32> to vector<8x1xf32>
    %cst_3 = arith.constant 1.280000e+02 : f32
    %7 = vector.broadcast %cst_3 : f32 to vector<8x1xf32>
    %8 = arith.divf %6, %7 : vector<8x1xf32>
    %cst_4 = arith.constant 9.99999974E-6 : f32
    %9 = vector.broadcast %cst_4 : f32 to vector<8x1xf32>
    %10 = arith.addf %8, %9 : vector<8x1xf32>
    %11 = math.rsqrt %10 : vector<8x1xf32>
    %12 = vector.broadcast %11 : vector<8x1xf32> to vector<8x128xf32>
    %13 = arith.mulf %0, %12 : vector<8x128xf32>
    %14 = vector.broadcast %3 : vector<1x128xf32> to vector<8x128xf32>
    %15 = arith.mulf %13, %14 : vector<8x128xf32>
    %c0_5 = arith.constant 0 : index
    %c0_6 = arith.constant 0 : index
    %16 = vector.load %arg4[%c0_5, %c0_6] : memref<128x128xbf16, #tpu.memory_space<vmem>>, vector<128x128xbf16>
    %c0_7 = arith.constant 0 : index
    %17 = memref.load %arg1[%c0_7] : memref<2xf32, #tpu.memory_space<smem>>
    %18 = math.absf %15 : vector<8x128xf32>
    %cst_8 = arith.constant dense<0xFF800000> : vector<8xf32>
    %19 = vector.multi_reduction <maximumf>, %18, %cst_8 [1] : vector<8x128xf32> to vector<8xf32>
    %20 = vector.shape_cast %19 : vector<8xf32> to vector<8x1xf32>
    %cst_9 = arith.constant 9.99999996E-13 : f32
    %21 = vector.broadcast %cst_9 : f32 to vector<8x1xf32>
    %22 = arith.maximumf %20, %21 : vector<8x1xf32>
    %23 = tpu.reciprocal %22 {approx = true} : vector<8x1xf32> -> vector<8x1xf32>
    %cst_10 = arith.constant 4.480000e+02 : f32
    %24 = vector.broadcast %cst_10 : f32 to vector<8x1xf32>
    %25 = arith.mulf %24, %23 : vector<8x1xf32>
    %26 = vector.broadcast %25 : vector<8x1xf32> to vector<8x128xf32>
    %27 = arith.mulf %15, %26 : vector<8x128xf32>
    %cst_11 = arith.constant -4.480000e+02 : f32
    %cst_12 = arith.constant 4.480000e+02 : f32
    %28 = vector.broadcast %cst_11 : f32 to vector<8x128xf32>
    %29 = arith.maximumf %28, %27 : vector<8x128xf32>
    %30 = vector.broadcast %cst_12 : f32 to vector<8x128xf32>
    %31 = arith.minimumf %30, %29 : vector<8x128xf32>
    %32 = arith.truncf %31 : vector<8x128xf32> to vector<8x128xf8E4M3FN>
    %33 = arith.extf %32 : vector<8x128xf8E4M3FN> to vector<8x128xbf16>
    %cst_13 = arith.constant dense<0.000000e+00> : vector<8x128xf32>
    %34 = tpu.matmul %33, %16, %cst_13 {dimension_numbers = #tpu.dot_dimension_numbers<[1], [0], [0], [1], [0, 0, 1, 1], [], []>} : vector<8x128xbf16>, vector<128x128xbf16>, vector<8x128xf32> -> vector<8x128xf32>
    %35 = vector.broadcast %17 : f32 to vector<8x1xf32>
    %36 = arith.mulf %22, %35 : vector<8x1xf32>
    %37 = vector.broadcast %36 : vector<8x1xf32> to vector<8x128xf32>
    %38 = arith.mulf %34, %37 : vector<8x128xf32>
    %39 = arith.addf %38, %2 : vector<8x128xf32>
    %40 = vector.extract_strided_slice %1 {offsets = [1, 0], sizes = [1, 128], strides = [1, 1]} : vector<3x128xf32> to vector<1x128xf32>
    %41 = arith.mulf %39, %39 : vector<8x128xf32>
    %cst_14 = arith.constant dense<0.000000e+00> : vector<8xf32>
    %42 = vector.multi_reduction <add>, %41, %cst_14 [1] : vector<8x128xf32> to vector<8xf32>
    %43 = vector.shape_cast %42 : vector<8xf32> to vector<8x1xf32>
    %cst_15 = arith.constant 1.280000e+02 : f32
    %44 = vector.broadcast %cst_15 : f32 to vector<8x1xf32>
    %45 = arith.divf %43, %44 : vector<8x1xf32>
    %cst_16 = arith.constant 9.99999974E-6 : f32
    %46 = vector.broadcast %cst_16 : f32 to vector<8x1xf32>
    %47 = arith.addf %45, %46 : vector<8x1xf32>
    %48 = math.rsqrt %47 : vector<8x1xf32>
    %49 = vector.broadcast %48 : vector<8x1xf32> to vector<8x128xf32>
    %50 = arith.mulf %39, %49 : vector<8x128xf32>
    %51 = vector.broadcast %40 : vector<1x128xf32> to vector<8x128xf32>
    %52 = arith.mulf %50, %51 : vector<8x128xf32>
    %c0_17 = arith.constant 0 : index
    %c0_18 = arith.constant 0 : index
    %53 = vector.load %arg5[%c0_17, %c0_18] : memref<128x128xbf16, #tpu.memory_space<vmem>>, vector<128x128xbf16>
    %c1 = arith.constant 1 : index
    %54 = memref.load %arg1[%c1] : memref<2xf32, #tpu.memory_space<smem>>
    %55 = math.absf %52 : vector<8x128xf32>
    %cst_19 = arith.constant dense<0xFF800000> : vector<8xf32>
    %56 = vector.multi_reduction <maximumf>, %55, %cst_19 [1] : vector<8x128xf32> to vector<8xf32>
    %57 = vector.shape_cast %56 : vector<8xf32> to vector<8x1xf32>
    %cst_20 = arith.constant 9.99999996E-13 : f32
    %58 = vector.broadcast %cst_20 : f32 to vector<8x1xf32>
    %59 = arith.maximumf %57, %58 : vector<8x1xf32>
    %60 = tpu.reciprocal %59 {approx = true} : vector<8x1xf32> -> vector<8x1xf32>
    %cst_21 = arith.constant 4.480000e+02 : f32
    %61 = vector.broadcast %cst_21 : f32 to vector<8x1xf32>
    %62 = arith.mulf %61, %60 : vector<8x1xf32>
    %63 = vector.broadcast %62 : vector<8x1xf32> to vector<8x128xf32>
    %64 = arith.mulf %52, %63 : vector<8x128xf32>
    %cst_22 = arith.constant -4.480000e+02 : f32
    %cst_23 = arith.constant 4.480000e+02 : f32
    %65 = vector.broadcast %cst_22 : f32 to vector<8x128xf32>
    %66 = arith.maximumf %65, %64 : vector<8x128xf32>
    %67 = vector.broadcast %cst_23 : f32 to vector<8x128xf32>
    %68 = arith.minimumf %67, %66 : vector<8x128xf32>
    %69 = arith.truncf %68 : vector<8x128xf32> to vector<8x128xf8E4M3FN>
    %70 = arith.extf %69 : vector<8x128xf8E4M3FN> to vector<8x128xbf16>
    %cst_24 = arith.constant dense<0.000000e+00> : vector<8x128xf32>
    %71 = tpu.matmul %70, %53, %cst_24 {dimension_numbers = #tpu.dot_dimension_numbers<[1], [0], [0], [1], [0, 0, 1, 1], [], []>} : vector<8x128xbf16>, vector<128x128xbf16>, vector<8x128xf32> -> vector<8x128xf32>
    %72 = vector.broadcast %54 : f32 to vector<8x1xf32>
    %73 = arith.mulf %59, %72 : vector<8x1xf32>
    %74 = vector.broadcast %73 : vector<8x1xf32> to vector<8x128xf32>
    %75 = arith.mulf %71, %74 : vector<8x128xf32>
    %76 = arith.addf %75, %39 : vector<8x128xf32>
    %77 = vector.extract_strided_slice %1 {offsets = [2, 0], sizes = [1, 128], strides = [1, 1]} : vector<3x128xf32> to vector<1x128xf32>
    %78 = arith.mulf %76, %76 : vector<8x128xf32>
    %cst_25 = arith.constant dense<0.000000e+00> : vector<8xf32>
    %79 = vector.multi_reduction <add>, %78, %cst_25 [1] : vector<8x128xf32> to vector<8xf32>
    %80 = vector.shape_cast %79 : vector<8xf32> to vector<8x1xf32>
    %cst_26 = arith.constant 1.280000e+02 : f32
    %81 = vector.broadcast %cst_26 : f32 to vector<8x1xf32>
    %82 = arith.divf %80, %81 : vector<8x1xf32>
    %cst_27 = arith.constant 9.99999974E-6 : f32
    %83 = vector.broadcast %cst_27 : f32 to vector<8x1xf32>
    %84 = arith.addf %82, %83 : vector<8x1xf32>
    %85 = math.rsqrt %84 : vector<8x1xf32>
    %86 = vector.broadcast %85 : vector<8x1xf32> to vector<8x128xf32>
    %87 = arith.mulf %76, %86 : vector<8x128xf32>
    %88 = vector.broadcast %77 : vector<1x128xf32> to vector<8x128xf32>
    %89 = arith.mulf %87, %88 : vector<8x128xf32>
    %c0_28 = arith.constant 0 : index
    %c0_29 = arith.constant 0 : index
    %90 = vector.load %arg6[%c0_28, %c0_29] : memref<8x128xf32, #tpu.memory_space<vmem>>, vector<8x128xf32>
    tpu.vector_store %arg6[%c0_28, %c0_29], %89 {strides = array<i32>} : memref<8x128xf32, #tpu.memory_space<vmem>>, vector<8x128xf32>,
    return
  }
  func.func @transform_0(%arg0: i32) -> i32 {
    %c0_i32 = arith.constant 0 : i32
    %c0_i32_0 = arith.constant 0 : i32
    return %c0_i32 : i32
  }
  func.func @transform_1(%arg0: i32) -> (i32, i32) {
    %c0_i32 = arith.constant 0 : i32
    %c0_i32_0 = arith.constant 0 : i32
    return %arg0, %c0_i32 : i32, i32
  }
  func.func @transform_2(%arg0: i32) -> (i32, i32) {
    %c0_i32 = arith.constant 0 : i32
    %c0_i32_0 = arith.constant 0 : i32
    %c0_i32_1 = arith.constant 0 : i32
    return %c0_i32, %c0_i32_0 : i32, i32
  }
  func.func @transform_3(%arg0: i32) -> (i32, i32) {
    %c0_i32 = arith.constant 0 : i32
    %c0_i32_0 = arith.constant 0 : i32
    %c0_i32_1 = arith.constant 0 : i32
    return %c0_i32, %c0_i32_0 : i32, i32
  }
  func.func @transform_4(%arg0: i32) -> (i32, i32) {
    %c0_i32 = arith.constant 0 : i32
    %c0_i32_0 = arith.constant 0 : i32
    %c0_i32_1 = arith.constant 0 : i32
    return %c0_i32, %c0_i32_0 : i32, i32
  }
  func.func @transform_5(%arg0: i32) -> (i32, i32) {
    %c0_i32 = arith.constant 0 : i32
    %c0_i32_0 = arith.constant 0 : i32
    return %arg0, %c0_i32 : i32, i32
  }
}

</mosaic_0001>

<bundles_post_ra>
// kernel: tpu_custom_call.1
= control target key start
LH: loop header
LB: loop body
LE: loop exit
PB: predicated region body
PF: predicated region fallthrough
CT: control target
= control target key end

     0   :  { %10 = vsyncpa [#allocation5], 0  ;;  %s1438_s0 = inlined_call_operand.hbm [shape: f32[2], index: 0, kind: input, shape index: {}]   ;;  %s1439_s1 = inlined_call_operand.hbm [shape: f32[16,128], index: 1, kind: input, shape index: {}]   ;;  %s1440_s2 = inlined_call_operand.hbm [shape: f32[3,128], index: 2, kind: input, shape index: {}]   ;;  %s1441_s3 = inlined_call_operand.hbm [shape: bf16[128,128], index: 3, kind: input, shape index: {}]   ;;  %s1442_s4 = inlined_call_operand.hbm [shape: bf16[128,128], index: 4, kind: input, shape index: {}]   ;;  %s1443_s5 = inlined_call_operand.hbm [shape: f32[16,128], index: 5, kind: output, shape index: {}]  }
   0x1   :  { %11 = vsyncpa [#allocation3], 0 }
   0x2   :  { %13 = vsyncpa [#allocation3 + $0x1], 0 }
   0x3   :  { %14 = vsyncpa [#allocation8], 0 }
   0x4   :  { %15 = vsyncpa [#allocation11], 0 }
   0x5   :  { %16 = vsyncpa [#allocation4], 0 }
   0x6   :  { %18 = vsyncpa [#allocation4 + $0x1], 0  ;;  %s1234_s18 = smov 0   ;;  %s1236_s19 = smov 0  }
   0x7   :  { %s1238_s20 = smov 0   ;;  %s1240_s21 = smov 0  }
   0x8 LB: > { %s187_s24 = sshll.u32 %s1440_s2, 4  ;;  %s1258_s25 = sadd.s32 4294967295, %s1195_s21   ;;  %s1195_s21 = sphi %s1240_s21, %s1455_s21   ;;  %s1191_s20 = sphi %s1238_s20, %s1454_s20   ;;  %s1187_s19 = sphi %s1236_s19, %s1453_s19   ;;  %s1183_s18 = sphi %s1234_s18, %s1452_s18   ;;  %s188_s24 = int_to_ptr.hbm [resolvable:$true] %s187_s24 }
   0x9   : > { %p776_p0 = scmp.ge.s32.totalorder %s1195_s21, 1  ;;  %p66_p1 = scmp.eq.s32.totalorder %s1258_s25, 0 }
   0xa   : > { %p165_p2 = scmp.lt.s32.totalorder %s1195_s21, 3  ;;  %s1197_s27 = smov [#allocation7]  }
   0xb   : > { %s189_s28 = sshll.u32 %s1197_s27, 4  ;;  %s177_s6 = sshll.u32 %s1438_s0, 4  ;;  %s190_s28 = int_to_ptr.vmem [resolvable:$true] %s189_s28  ;;  %s178_s6 = int_to_ptr.hbm [resolvable:$true] %s177_s6 }
   0xc   : > { %p1263_p3 = pnand %p776_p0, %p165_p2  ;;  %s198_s10 = sshll.u32 %s1441_s3, 4  ;;  %s199_s10 = int_to_ptr.hbm [resolvable:$true] %s198_s10 }
   0xd   : > { %s1198_s11 = smov [#allocation9]   ;;  %s1199_s13 = smov [#allocation2]  }
   0xe   : > { %p898_p5 = pneg %p1263_p3  ;;  %s200_s12 = sshll.u32 %s1198_s11, 4  ;;  %s201_s12 = int_to_ptr.vmem [resolvable:$true] %s200_s12 }
   0xf   : > { %s212_s16 = sshll.u32 %s1442_s4, 4  ;;  %s1200_s17 = smov 64   ;;  %s213_s16 = int_to_ptr.hbm [resolvable:$true] %s212_s16 }
  0x10   : > { %p1275_p6 = pnand %p898_p5, %p66_p1  ;;  %s1201_s22 = smov 4  }
  0x11   : > { %s1202_s23 = smov [#allocation10]   ;;  %s775_s27 = sadd.s32 4294967294, %s1195_s21  }
  0x12   : > { %904 = dma.hbm_to_vmem [thread:$0]  (!%p1275_p6), %s188_s24, 64, %s190_s28, [#allocation8]  }
  0x13   : > { %901 = dma.hbm_to_smem (!%p1275_p6), %s178_s6, 16, %s1199_s13, [#allocation5]  }
  0x14   : > { %907 = dma.hbm_to_vmem [thread:$0]  (!%p1275_p6), %s199_s10, 1024, %s201_s12, [#allocation8], %s1200_s17, %s1200_s17, %s1201_s22  }
  0x15   : > { %s214_s24 = sshll.u32 %s1202_s23, 4  ;;  %s1295_s28 = sadd.s32 1, %s1195_s21   ;;  %s215_s24 = int_to_ptr.vmem [resolvable:$true] %s214_s24 }
  0x16   : > { %910 = dma.hbm_to_vmem [thread:$0]  (!%p1275_p6), %s213_s16, 1024, %s215_s24, [#allocation11], %s1200_s17, %s1200_s17, %s1201_s22  }
  0x17   : > { %s49_s29 = ssub.s32 %s1195_s21, %s1295_s28  ;;  %s52_s30 = sadd.s32 1, %s1191_s20 }
  0x18   : > { %p50_p7 = scmp.eq.s32.totalorder %s49_s29, 0  ;;  %p59_p8 = scmp.ne.s32.totalorder %s1191_s20, %s1187_s19 }
  0x19   : > { %p60_p9 = scmp.eq.s32.totalorder %s1195_s21, 0  ;;  %p65_p10 = scmp.ne.s32.totalorder %s1187_s19, %s1183_s18 }
  0x1a   : > { %s1306_s6 = scalar_select %p50_p7, %s1191_s20, %s52_s30  }
  0x1b   : > { %p1308_p11 = por %p60_p9, %p59_p8  ;;  %p1314_p12 = por %p66_p1, %p65_p10 }
  0x1c   : > { %p152_p13 = scmp.eq.s32.totalorder %s1258_s25, 1  ;;  %p158_p0 = scmp.eq.s32.totalorder %s775_s27, 1 }
  0x1d   : > { %p923_p2 = scmp.lt.s32.totalorder %s1195_s21, 2  ;;  %s228_s9 = sand.u32 1, %s1191_s20  }
  0x1e   : > { %p1321_p5 = por %p152_p13, %p59_p8  ;;  %p1325_p6 = por %p158_p0, %p65_p10 }
  0x1f   : > { %s782_s12 = sshll.u32 %s228_s9, 3  ;;  %s783_s13 = sshll.u32 %s1195_s21, 3 }
  0x20   : > { %s236_s16 = scalar_lea.hbm %s1439_s1, %s783_s13  ;;  %s232_s17 = scalar_lea.vmem [#allocation6], %s782_s12 }
  0x21   : > { %s240_s22 = sshll.u32 %s232_s17, 4  ;;  %s238_s23 = sshll.u32 %s236_s16, 4  ;;  %s241_s22 = int_to_ptr.vmem [resolvable:$true] %s240_s22  ;;  %s239_s23 = int_to_ptr.hbm [resolvable:$true] %s238_s23 }
  0x22   : > { %p1335_p7 = pnand %p923_p2, %p1308_p11  ;;  %s229_s27 = scalar_lea.sflag [#allocation3], %s228_s9 }
  0x23   : > { %s1087_s29 = sshra.s32 %s239_s23, 4  ;;  %s1094_s14 = scalar_lea.hbm %s1439_s1, 16  ;;  %s1088_s29 = int_to_ptr.hbm [resolvable:$true] %s1087_s29 }
  0x24   : > { %s1089_s30 = scalar_lea.hbm %s1088_s29, 8  ;;  %p1091_p9 = pneg %p1335_p7 }
  0x25   : > { %p1090_p8 = scmp.ne.s32.totalorder %s1088_s29, %s1089_s30  ;;  %p1095_p11 = scmp.lt.s32.totalorder %s1088_s29, %s1439_s1 }
  0x26   : > { %p1096_p0 = scmp.lt.s32.totalorder %s1094_s14, %s1089_s30 }
  0x27   : > { %p1092_p10 = pnand %p1091_p9, %p1090_p8 }
  0x28   : > { %p1097_p2 = por %p1096_p0, %p1095_p11 }
  0x29   : > { %p1093_p13 = pneg %p1092_p10 }
  0x2b   : > { %p1098_p4 = pnand %p1097_p2, %p1093_p13 }
  0x2d   : > { %1101 = shalt.err (!%p1098_p4)
}
  0x2e   : > { %914 = dma.hbm_to_vmem [thread:$0]  (!%p1335_p7), %s239_s23, 128, %s241_s22, %s229_s27  }
  0x2f   : > { %249 = sbr.rel (%p1263_p3) target bundleno = 1109 (0x455), region = 40 }
  0x34   : > { %1162 = dma.done.wait (%p66_p1), [#allocation5], 16  }
  0x35   : > { %1164 = vsyncadd (%p66_p1), [#allocation5], 4294967280  ;;  %s1356_s9 = sand.u32 1, %s1187_s19  }
  0x36   : > { %s786_s16 = sshll.u32 %s1356_s9, 3  ;;  %s257_s17 = scalar_lea.sflag [#allocation3], %s1356_s9 }
  0x37   : > { %s260_s22 = scalar_lea.vmem [#allocation6], %s786_s16 }
  0x38   : > { %1166 = dma.done.wait (%p1314_p12), %s257_s17, 128  }
  0x39   : > { %1168 = vsyncadd (%p1314_p12), %s257_s17, 4294967168 }
  0x3a   : > { %1170 = dma.done.wait (%p66_p1), [#allocation8], 1088  }
  0x3b   : > { %1172 = vsyncadd (%p66_p1), [#allocation8], 4294966208 }
  0x3c   : > { %1174 = dma.done.wait (%p66_p1), [#allocation11], 1024  }
  0x3d   : > { %1176 = vsyncadd (%p66_p1), [#allocation11], 4294966272 }
  0x3e   : > { %281 = sfence }
  0x3f   : > { %v304_v0 = vld [vmem:[%s260_s22] sm:$0xff]  ;;  %v1203_v12 = vmov 128.0   ;;  %v1379_v27 = vld [vmem:[#allocation7] sm:$0x7]  ;;  %s1382_s26 = sld [smem:[#allocation2]]  ;;  %s1386_s7 = scalar_lea.vmem [#allocation12], %s786_s16 }
  0x40   : > { %v318_v1 = vmul.f32 %v304_v0, %v304_v0  ;;  %968 = vrsqrt.f32 %v304_v0  ;;  %vm313_vm0 = vcmp.eq.f32.partialorder %v304_v0, inf  ;;  %v316_v8 = vand.u32 2147483648, %v304_v0  ;;  %v794_v34 = vld [vmem:[#allocation9] sm:$0xf]  ;;  %v862_v35 = vld [vmem:[#allocation9] sm:$0xf0] }
  0x41   : > { %vm315_vm1 = vcmp.eq.f32.partialorder %v304_v0, 0.0  ;;  %970 = vrcp.f32 %v1203_v12  ;;  %v341_v29 = vperm.slane %v1379_v27, 0  ;;  %v798_v36 = vld [vmem:[#allocation9 + $0x8] sm:$0xf]  ;;  %v863_v37 = vld [vmem:[#allocation9 + $0x8] sm:$0xf0] }
  0x42   : > { %319 = vadd.xlane.f32.xlu0 %v318_v1  ;;  %v802_v38 = vld [vmem:[#allocation9 + $0x10] sm:$0xf]  ;;  %v864_v39 = vld [vmem:[#allocation9 + $0x10] sm:$0xf0]  ;;  %v806_v40 = vld [vmem:[#allocation9 + $0x18] sm:$0xf] }
  0x43   : > { %v865_v41 = vld [vmem:[#allocation9 + $0x18] sm:$0xf0]  ;;  %v810_v42 = vld [vmem:[#allocation9 + $0x20] sm:$0xf]  ;;  %v866_v43 = vld [vmem:[#allocation9 + $0x20] sm:$0xf0] }
  0x44   : > { %v814_v44 = vld [vmem:[#allocation9 + $0x28] sm:$0xf]  ;;  %v867_v45 = vld [vmem:[#allocation9 + $0x28] sm:$0xf0]  ;;  %v818_v46 = vld [vmem:[#allocation9 + $0x30] sm:$0xf] }
  0x45   : > { %v868_v47 = vld [vmem:[#allocation9 + $0x30] sm:$0xf0]  ;;  %v822_v48 = vld [vmem:[#allocation9 + $0x38] sm:$0xf]  ;;  %v869_v49 = vld [vmem:[#allocation9 + $0x38] sm:$0xf0] }
  0x46   : > { %v969_v2 = vpop.eup %968 }
  0x47   : > { %v307_v3 = vmul.f32 %v969_v2, %v304_v0  ;;  %v971_v13 = vpop.eup %970 }
  0x48   : > { %v322_v14 = vmul.f32 128.0, %v971_v13  ;;  %vm326_vm2 = vweird.f32 %v971_v13 }
  0x49   : > { %v308_v4 = vmul.f32 %v969_v2, %v307_v3 }
  0x4a   : > { %v323_v15 = vsub.f32 1.0, %v322_v14 }
  0x4b   : > { %v309_v5 = vmul.f32 0.5, %v308_v4 }
  0x4c   : > { %v324_v16 = vmul.f32 %v971_v13, %v323_v15 }
  0x4d   : > { %v310_v6 = vsub.f32 1.5, %v309_v5 }
  0x4e   : > { %v325_v17 = vadd.f32 %v971_v13, %v324_v16 }
  0x4f   : > { %v311_v7 = vmul.f32 %v969_v2, %v310_v6 }
  0x50   : > { %v1376_v18 = vsel %vm326_vm2, %v971_v13, %v325_v17 }
  0x51   : > { %v312_v9 = vmul.f32 %v311_v7, %v304_v0 }
  0x53   : > { %v314_v10 = vsel %vm313_vm0, %v304_v0, %v312_v9 }
  0x54   : > { %v1374_v11 = vsel %vm315_vm1, %v316_v8, %v314_v10 }
  0xb5   : > { %v320_v19 = vpop.xlane.xlu0 %319 }
  0xb6   : > { %v328_v20 = vmul.f32 %v1376_v18, %v320_v19 }
  0xb8   : > { %v329_v21 = vadd.f32 1e-05, %v328_v20 }
  0xba   : > { %972 = vrsqrt.f32 %v329_v21  ;;  %vm336_vm4 = vweird.f32 %v329_v21 }
  0xc0   : > { %v973_v22 = vpop.eup %972 }
  0xc1   : > { %v331_v23 = vmul.f32 %v973_v22, %v329_v21  ;;  %vm337_vm3 = vweird.f32 %v973_v22 }
  0xc2   : > { %vm338_vm5 = vmor %vm336_vm4, %vm337_vm3 }
  0xc3   : > { %v332_v24 = vmul.f32 %v973_v22, %v331_v23 }
  0xc5   : > { %v333_v25 = vmul.f32 0.5, %v332_v24 }
  0xc7   : > { %v334_v26 = vsub.f32 1.5, %v333_v25 }
  0xc9   : > { %v335_v28 = vmul.f32 %v973_v22, %v334_v26 }
  0xcb   : > { %v339_v30 = vsel %vm338_vm5, %v973_v22, %v335_v28 }
  0xcc   : > { %v340_v31 = vmul.f32 %v339_v30, %v304_v0 }
  0xce   : > { %v342_v32 = vmul.f32 %v341_v29, %v340_v31 }
  0xd0   : > { %v360_v33 = vand.u32 2147483647, %v342_v32 }
  0xd2   : > { %361 = vmax.xlane.f32.xlu0 %v360_v33 }
 0x145   : > { %v362_v50 = vpop.xlane.xlu0 %361 }
 0x146   : > { %v363_v51 = vmax.f32 %v362_v50, 1e-12 }
 0x148   : > { %974 = vrcp.f32 %v363_v51 }
 0x14e   : > { %v975_v52 = vpop.eup %974 }
 0x14f   : > { %v365_v53 = vmul.f32 448.0, %v975_v52 }
 0x151   : > { %v366_v54 = vmul.f32 %v365_v53, %v342_v32 }
 0x153   : > { %v791_v55 = vclamps-f32 %v366_v54, 448.0 }
 0x155   : > { %v369_v56 = vand.u32 2147483647, %v791_v55  ;;  %v370_v57 = vmul.f32 0.0625, %v791_v55  ;;  %v374_v58 = vshrl.u32 %v791_v55, 24  ;;  %vm372_vm6 = vweird.f32 %v791_v55 }
 0x157   : > { %v371_v59 = vcvt.f32.f8e4m3b11 %v370_v57  ;;  %v375_v60 = vand.u32 128, %v374_v58  ;;  %vm376_vm7 = vcmp.le.f32.partialorder %v369_v56, 0.0009765625 }
 0x159   : > { %v373_v61 = vsel %vm372_vm6, 127, %v371_v59 }
 0x15a   : > { %v377_v62 = vsel %vm376_vm7, %v375_v60, %v373_v61 }
 0x15b   : > { %v378_v63 = vpack.c.b16 %v377_v62, %v377_v62 }
 0x15d   : > { %v379_v0 = vpack.c.b8 %v378_v63, %v378_v63 }
 0x15e   : > { %v823_v7 = vor.u32 %v869_v49, %v822_v48  ;;  %v819_v8 = vor.u32 %v868_v47, %v818_v46  ;;  %v815_v9 = vor.u32 %v867_v45, %v814_v44  ;;  %v811_v10 = vor.u32 %v866_v43, %v810_v42  ;;  %s1397_s23 = sld [smem:[#allocation2 + $0x1]]  ;;  %v871_v42 = vld [vmem:[#allocation10 + $0x8] sm:$0xf0]  ;;  %v836_v43 = vld [vmem:[#allocation10 + $0x10] sm:$0xf] }
 0x15f   : > { %381 = vst [vmem:[#allocation13] sm:$0xff] %v379_v0  ;;  %v807_v12 = vor.u32 %v865_v41, %v806_v40  ;;  %v803_v13 = vor.u32 %v864_v39, %v802_v38  ;;  %v799_v14 = vor.u32 %v863_v37, %v798_v36  ;;  %v795_v15 = vor.u32 %v862_v35, %v794_v34  ;;  %v828_v39 = vld [vmem:[#allocation10] sm:$0xf]  ;;  %v870_v40 = vld [vmem:[#allocation10] sm:$0xf0] }
 0x160   : > { %460 = vmatpush.bf16.msra.mxu0 %v823_v7  ;;  %v473_v17 = vstv %s1382_s26  ;;  %v832_v41 = vld [vmem:[#allocation10 + $0x8] sm:$0xf]  ;;  %v872_v44 = vld [vmem:[#allocation10 + $0x10] sm:$0xf0]  ;;  %v840_v45 = vld [vmem:[#allocation10 + $0x18] sm:$0xf] }
 0x161   : > { %v474_v19 = vmul.f32 %v473_v17, %v363_v51  ;;  %v873_v46 = vld [vmem:[#allocation10 + $0x18] sm:$0xf0]  ;;  %v844_v47 = vld [vmem:[#allocation10 + $0x20] sm:$0xf]  ;;  %v874_v48 = vld [vmem:[#allocation10 + $0x20] sm:$0xf0] }
 0x162   : > { %v848_v49 = vld [vmem:[#allocation10 + $0x28] sm:$0xf]  ;;  %v875_v50 = vld [vmem:[#allocation10 + $0x28] sm:$0xf0]  ;;  %v852_v51 = vld [vmem:[#allocation10 + $0x30] sm:$0xf] }
 0x163   : > { %v876_v52 = vld [vmem:[#allocation10 + $0x30] sm:$0xf0]  ;;  %v856_v53 = vld [vmem:[#allocation10 + $0x38] sm:$0xf]  ;;  %v877_v54 = vld [vmem:[#allocation10 + $0x38] sm:$0xf0] }
 0x164   : > { %461 = vmatpush.bf16.msra.mxu0 %v819_v8 }
 0x166   : > { %v382_v1 = vld [vmem:[#allocation13] sm:$0x3] }
 0x167   : > { %v383_v2 = vunpack.c.0.f8e4m3b11 %v382_v1 }
 0x168   : > { %462 = vmatpush.bf16.msra.mxu0 %v815_v9 }
 0x169   : > { %v387_v3 = vand.u32 2147483647, %v383_v2  ;;  %vm389_vm8 = vcmp.ne.f32.partialorder %v383_v2, %v383_v2  ;;  %v390_v4 = vmul.f32 16.0, %v383_v2 }
 0x16b   : > { %vm388_vm9 = vcmp.gt.f32.partialorder %v387_v3, 29.0  ;;  %v391_v5 = vsel %vm389_vm8, -0.0, %v390_v4 }
 0x16c   : > { %v392_v6 = vsel %vm388_vm9, nan, %v391_v5  ;;  %463 = vmatpush.bf16.msra.mxu0 %v811_v10 }
 0x16d   : > { %v411_v16 = vpack.c.bf16 %v392_v6, %v392_v6 }
 0x170   : > { %464 = vmatpush.bf16.msra.mxu0 %v807_v12 }
 0x174   : > { %465 = vmatpush.bf16.msra.mxu0 %v803_v13 }
 0x178   : > { %466 = vmatpush.bf16.msra.mxu0 %v799_v14 }
 0x17c   : > { %467 = vmatpush.bf16.msra.mxu0 %v795_v15 }
 0x17f   : > { %468 = vmatmul.bf16.vlgmr.msra.gmra.mxu0 %v411_v16 }
 0x1fc   : > { %v469_v20 = vpop.f32.mrf.mxu0 }
 0x1fd   : > { %v475_v21 = vmul.f32 %v474_v19, %v469_v20 }
 0x1ff   : > { %v1390_v22 = vadd.f32 %v475_v21, %v1374_v11  ;;  %v493_v11 = vperm.slane %v1379_v27, 1 }
 0x201   : > { %v477_v23 = vmul.f32 %v1390_v22, %v1390_v22 }
 0x203   : > { %478 = vadd.xlane.f32.xlu0 %v477_v23 }
 0x204   : > { %v471_v24 = vpop.f32.mrf.mxu0 }
 0x276   : > { %v479_v25 = vpop.xlane.xlu0 %478 }
 0x277   : > { %v480_v26 = vmul.f32 %v479_v25, %v1376_v18 }
 0x279   : > { %v481_v28 = vadd.f32 1e-05, %v480_v26 }
 0x27b   : > { %976 = vrsqrt.f32 %v481_v28  ;;  %vm488_vm11 = vweird.f32 %v481_v28 }
 0x281   : > { %v977_v29 = vpop.eup %976 }
 0x282   : > { %v483_v30 = vmul.f32 %v977_v29, %v481_v28  ;;  %vm489_vm10 = vweird.f32 %v977_v29 }
 0x283   : > { %vm490_vm12 = vmor %vm488_vm11, %vm489_vm10 }
 0x284   : > { %v484_v31 = vmul.f32 %v977_v29, %v483_v30 }
 0x286   : > { %v485_v32 = vmul.f32 0.5, %v484_v31 }
 0x288   : > { %v486_v33 = vsub.f32 1.5, %v485_v32 }
 0x28a   : > { %v487_v34 = vmul.f32 %v977_v29, %v486_v33 }
 0x28c   : > { %v491_v35 = vsel %vm490_vm12, %v977_v29, %v487_v34 }
 0x28d   : > { %v492_v36 = vmul.f32 %v491_v35, %v1390_v22 }
 0x28f   : > { %v494_v37 = vmul.f32 %v493_v11, %v492_v36 }
 0x291   : > { %v512_v38 = vand.u32 2147483647, %v494_v37 }
 0x293   : > { %513 = vmax.xlane.f32.xlu0 %v512_v38 }
 0x306   : > { %v514_v55 = vpop.xlane.xlu0 %513 }
 0x307   : > { %v515_v56 = vmax.f32 %v514_v55, 1e-12 }
 0x309   : > { %978 = vrcp.f32 %v515_v56 }
 0x30f   : > { %v979_v57 = vpop.eup %978 }
 0x310   : > { %v517_v58 = vmul.f32 448.0, %v979_v57 }
 0x312   : > { %v518_v59 = vmul.f32 %v517_v58, %v494_v37 }
 0x314   : > { %v825_v60 = vclamps-f32 %v518_v59, 448.0 }
 0x316   : > { %v521_v61 = vand.u32 2147483647, %v825_v60  ;;  %v522_v62 = vmul.f32 0.0625, %v825_v60  ;;  %v526_v63 = vshrl.u32 %v825_v60, 24  ;;  %vm524_vm13 = vweird.f32 %v825_v60 }
 0x318   : > { %v523_v0 = vcvt.f32.f8e4m3b11 %v522_v62  ;;  %v527_v1 = vand.u32 128, %v526_v63  ;;  %vm528_vm14 = vcmp.le.f32.partialorder %v521_v61, 0.0009765625 }
 0x31a   : > { %v525_v2 = vsel %vm524_vm13, 127, %v523_v0 }
 0x31b   : > { %v529_v3 = vsel %vm528_vm14, %v527_v1, %v525_v2 }
 0x31c   : > { %v530_v4 = vpack.c.b16 %v529_v3, %v529_v3 }
 0x31e   : > { %v531_v5 = vpack.c.b8 %v530_v4, %v530_v4 }
 0x31f   : > { %v857_v13 = vor.u32 %v877_v54, %v856_v53  ;;  %v853_v14 = vor.u32 %v876_v52, %v852_v51  ;;  %v849_v15 = vor.u32 %v875_v50, %v848_v49  ;;  %v845_v16 = vor.u32 %v874_v48, %v844_v47  ;;  %s859_s24 = sshll.u32 %s1258_s25, 3  ;;  %s661_s12 = sshll.u32 %s1386_s7, 4  ;;  %s662_s12 = int_to_ptr.vmem [resolvable:$true] %s661_s12 }
 0x320   : > { %533 = vst [vmem:[#allocation14] sm:$0xff] %v531_v5  ;;  %v841_v17 = vor.u32 %v873_v46, %v840_v45  ;;  %v837_v19 = vor.u32 %v872_v44, %v836_v43  ;;  %v833_v20 = vor.u32 %v871_v42, %v832_v41  ;;  %v829_v21 = vor.u32 %v870_v40, %v828_v39  ;;  %s659_s30 = scalar_lea.hbm %s1443_s5, %s859_s24  ;;  %s649_s25 = scalar_lea.sflag [#allocation4], %s1356_s9 }
 0x321   : > { %612 = vmatpush.bf16.msra.mxu1 %v857_v13  ;;  %v625_v24 = vstv %s1397_s23  ;;  %s663_s13 = sshll.u32 %s659_s30, 4  ;;  %s1137_s17 = scalar_lea.hbm %s1443_s5, 16  ;;  %s664_s13 = int_to_ptr.hbm [resolvable:$true] %s663_s13 }
 0x322   : > { %v626_v25 = vmul.f32 %v625_v24, %v515_v56  ;;  %s1131_s14 = sshra.s32 %s664_s13, 4  ;;  %s1132_s14 = int_to_ptr.hbm [resolvable:$true] %s1131_s14 }
 0x323   : > { %s1133_s15 = scalar_lea.hbm %s1132_s14, 8  ;;  %p1138_p12 = scmp.lt.s32.totalorder %s1132_s14, %s1443_s5 }
 0x324   : > { %p1134_p1 = scmp.ne.s32.totalorder %s1132_s14, %s1133_s15  ;;  %p1139_p7 = scmp.lt.s32.totalorder %s1137_s17, %s1133_s15 }
 0x325   : > { %613 = vmatpush.bf16.msra.mxu1 %v853_v14 }
 0x326   : > { %p1135_p3 = pnand %p1134_p1, %p1321_p5  ;;  %p1140_p8 = por %p1139_p7, %p1138_p12 }
 0x327   : > { %v534_v6 = vld [vmem:[#allocation14] sm:$0x3] }
 0x328   : > { %v535_v7 = vunpack.c.0.f8e4m3b11 %v534_v6  ;;  %p1136_p4 = pneg %p1135_p3 }
 0x329   : > { %614 = vmatpush.bf16.msra.mxu1 %v849_v15 }
 0x32a   : > { %v539_v8 = vand.u32 2147483647, %v535_v7  ;;  %vm541_vm15 = vcmp.ne.f32.partialorder %v535_v7, %v535_v7  ;;  %v542_v9 = vmul.f32 16.0, %v535_v7  ;;  %p1141_p9 = pnand %p1140_p8, %p1136_p4 }
 0x32c   : > { %vm540_vm0 = vcmp.gt.f32.partialorder %v539_v8, 29.0  ;;  %v543_v10 = vsel %vm541_vm15, -0.0, %v542_v9 }
 0x32d   : > { %v544_v12 = vsel %vm540_vm0, nan, %v543_v10  ;;  %615 = vmatpush.bf16.msra.mxu1 %v845_v16 }
 0x32e   : > { %v563_v23 = vpack.c.bf16 %v544_v12, %v544_v12 }
 0x331   : > { %616 = vmatpush.bf16.msra.mxu1 %v841_v17 }
 0x335   : > { %617 = vmatpush.bf16.msra.mxu1 %v837_v19 }
 0x339   : > { %618 = vmatpush.bf16.msra.mxu1 %v833_v20 }
 0x33d   : > { %619 = vmatpush.bf16.msra.mxu1 %v829_v21 }
 0x340   : > { %620 = vmatmul.bf16.vlgmr.msra.gmra.mxu1 %v563_v23 }
 0x3bd   : > { %v621_v26 = vpop.f32.mrf.mxu1 }
 0x3be   : > { %v627_v28 = vmul.f32 %v626_v25, %v621_v26 }
 0x3c0   : > { %v628_v29 = vadd.f32 %v627_v28, %v1390_v22 }
 0x3c2   : > { %v629_v30 = vmul.f32 %v628_v29, %v628_v29 }
 0x3c4   : > { %630 = vadd.xlane.f32.xlu0 %v629_v30 }
 0x3c5   : > { %v623_v31 = vpop.f32.mrf.mxu1 }
 0x437   : > { %v631_v32 = vpop.xlane.xlu0 %630 }
 0x438   : > { %v632_v33 = vmul.f32 %v631_v32, %v1376_v18  ;;  %v645_v18 = vperm.slane %v1379_v27, 2 }
 0x43a   : > { %v633_v34 = vadd.f32 1e-05, %v632_v33 }
 0x43c   : > { %980 = vrsqrt.f32 %v633_v34  ;;  %vm640_vm2 = vweird.f32 %v633_v34 }
 0x442   : > { %v981_v11 = vpop.eup %980 }
 0x443   : > { %v635_v35 = vmul.f32 %v981_v11, %v633_v34  ;;  %vm641_vm1 = vweird.f32 %v981_v11 }
 0x444   : > { %vm642_vm3 = vmor %vm640_vm2, %vm641_vm1 }
 0x445   : > { %v636_v36 = vmul.f32 %v981_v11, %v635_v35 }
 0x447   : > { %v637_v37 = vmul.f32 0.5, %v636_v36 }
 0x449   : > { %v638_v38 = vsub.f32 1.5, %v637_v37 }
 0x44b   : > { %v639_v22 = vmul.f32 %v981_v11, %v638_v38 }
 0x44d   : > { %v643_v39 = vsel %vm642_vm3, %v981_v11, %v639_v22 }
 0x44e   : > { %v644_v40 = vmul.f32 %v643_v39, %v628_v29 }
 0x450   : > { %v646_v41 = vmul.f32 %v645_v18, %v644_v40 }
 0x452   : > { %647 = vst [vmem:[%s1386_s7] sm:$0xff] %v646_v41 }
 0x453   : > { %1144 = shalt.err (!%p1141_p9)
}
 0x454   : > { %896 = dma.vmem_to_hbm [thread:$0]  (%p1321_p5), %s662_s12, 128, %s664_s13, %s649_s25  }
 0x455 PF: > { %s675_s9 = sand.u32 1, %s1183_s18   ;;  %p1451_p10 = scmp.ge.s32.totalorder %s1195_s21, 2 }
 0x456   : > { %s676_s7 = scalar_lea.sflag [#allocation4], %s675_s9 }
 0x457   : > { %p916_p13 = pnand %p1451_p10, %p1325_p6 }
 0x459   : > { %p917_p11 = pneg %p916_p13 }
 0x45b   : > { %1178 = dma.done.wait (%p917_p11), %s676_s7, 128  }
 0x45c   : > { %1180 = vsyncadd (%p917_p11), %s676_s7, 4294967168  ;;  %p21_p0 = scmp.ge.s32.totalorder %s1295_s28, 4   ;;  %s1452_s18 = smov %s1187_s19 }
 0x45d   : > { %s1453_s19 = smov %s1191_s20  ;;  %s1454_s20 = smov %s1306_s6 }
 0x45e   : > { %s1455_s21 = smov %s1295_s28  ;;  %23 = sbr.rel (!%p21_p0) target bundleno = 8 (0x8), region = 104 }
 0x463   :  { %682 = vsyncpa [#allocation3], 1 }
 0x464   :  { %684 = vsyncpa [#allocation3 + $0x1], 1 }
 0x465   :  { %685 = vsyncpa [#allocation8], 1 }
 0x466   :  { %686 = vsyncpa [#allocation11], 1 }
 0x467   :  { %687 = vsyncpa [#allocation4], 1 }
 0x468   :  { %689 = vsyncpa [#allocation4 + $0x1], 1 }
 0x469   :  { %690 = vsyncpa [#allocation5], 1 }
 0x46a   :  { %692 = vsyncpa [#allocation5 + $0x1], 1 }

</bundles_post_ra>
